<compile_context>
chip_gen: v7x
topology: tpu7x:2x2x1
jax: 0.10.0
libtpu: 0.0.40
codegen_flags: <defaults>
</compile_context>

<pallas_src>
import functools
import math

import jax
import jax.numpy as jnp
from jax import lax
from jax.experimental import pallas as pl
from jax.experimental.pallas import tpu as pltpu


# ----------------------------- hardware queries -----------------------------
def _vmem_capacity_bytes():
    """Per-core VMEM capacity; conservative fallback (v7x per-TC) if unknown."""
    try:
        info = pltpu.get_tpu_info()
        cap = getattr(info, "vmem_capacity_bytes", None)
        if cap:
            return int(cap)
    except Exception:
        pass
    return 64 * 1024 * 1024


def _mxu_contraction_depth():
    """MXU systolic depth: 256 on v6e/v7x, 128 on v5e. Fallback 256."""
    try:
        info = pltpu.get_tpu_info()
        for name in ("mxu_contracting_size", "mxu_size", "mxu_depth"):
            v = getattr(info, name, None)
            if v:
                return int(v)
    except Exception:
        pass
    return 256


# --------------------------- tile-size selection -----------------------------
def _pick_stage1_batch_tile(B, L, D, K, budget_bytes):
    """Largest divisor of B whose working set fits; prefer Bt*L >= 256 (MXU M fill),
    otherwise keep >=2 grid steps so both v7x TensorCores get stage-1 work."""
    divisors = [d for d in range(1, B + 1) if B % d == 0]

    def step_bytes(bt):
        x_in = 2 * bt * L * D * 4          # double-buffered f32 input
        y_out = 2 * bt * L * D * 2         # double-buffered bf16 output
        slab = bt * L * K * D * 2          # fused-tap bf16 operand
        tmps = 2 * bt * L * D * 4          # conv + centered f32 temporaries
        return x_in + y_out + slab + tmps

    fitting = [d for d in divisors if step_bytes(d) <= budget_bytes] or [1]
    for d in fitting:
        if d * L >= 256:
            return d
    best = fitting[-1]
    if best == B and B > 1 and len(fitting) > 1:
        best = fitting[-2]
    return best


def _pick_stage2_tiles(B, L, D, budget_bytes):
    """Return (tr, tc, Lp): lane-dense col tile, budget-maximized row tile, padded L."""
    if L <= 256:
        # whole-array tiles: block equals full dims, so (8,128) rules are satisfied
        return L, L, L
    if L % 256 == 0:
        tc, Lp = 256, L
    elif L % 128 == 0:
        tc, Lp = 128, L
    else:
        tc = 128
        Lp = pl.cdiv(L, 128) * 128         # pad; never emit a full-L tile

    def step_bytes(tr):
        rows_in = 2 * B * tr * D * 2       # double-buffered bf16 rows
        cols_in = 2 * B * tc * D * 2       # double-buffered bf16 cols
        out = 2 * B * tr * tc * 4          # double-buffered f32 output block
        tmps = 2 * B * tr * tc * 4         # s / e f32 temporaries
        return rows_in + cols_in + out + tmps

    tr = tc
    for cand in range(Lp, tc - 1, -tc):
        if Lp % cand == 0 and step_bytes(cand) <= budget_bytes:
            tr = cand
            break
    return tr, tc, Lp


# ---------------------------------------------------------------------------
# Stage 1: circular conv + normalization (+ baked Gram scale), bf16 output.
# ---------------------------------------------------------------------------
def _conv_norm_kernel(x_ref, w_ref, yn_ref, *, kernel_size, fuse_taps, gram_scale):
    """x_ref: (Bt, L, D) f32; w_ref: (K*D, D) bf16 fused taps; yn_ref: (Bt, L, D) bf16."""
    bt, L, D = x_ref.shape
    K = kernel_size
    half = K // 2

    xb = x_ref[...]
    # Circular padding along L (matches PyTorch padding_mode='circular'):
    # xext[:, j, :] = x[:, (j - half) mod L, :]
    if half > 0:
        xext = jnp.concatenate([xb[:, L - half:, :], xb, xb[:, :half, :]], axis=1)
    else:
        xext = xb

    if fuse_taps:
        # Fuse all K taps into one (Bt*L, K*D) @ (K*D, D) matmul, bf16 in / f32 acc.
        slab = jnp.concatenate([xext[:, k:k + L, :] for k in range(K)], axis=-1)
        slab = slab.reshape(bt * L, K * D).astype(jnp.bfloat16)
        conv = jnp.dot(slab, w_ref[...], preferred_element_type=jnp.float32)
    else:
        # D alone already fills the MXU depth: skip the slab, accumulate per tap.
        conv = jnp.zeros((bt * L, D), jnp.float32)
        for k in range(K):
            lhs = xext[:, k:k + L, :].reshape(bt * L, D).astype(jnp.bfloat16)
            conv = conv + jnp.dot(lhs, w_ref[k * D:(k + 1) * D, :],
                                  preferred_element_type=jnp.float32)
    conv = conv.reshape(bt, L, D)

    # Two-pass mean / biased variance over the sequence axis (numerically safe:
    # var >= 0 by construction). Matches torch.var(unbiased=False) + eps inside sqrt.
    inv_l = 1.0 / L
    mean = jnp.sum(conv, axis=1, keepdims=True) * inv_l            # (Bt, 1, D)
    centered = conv - mean
    var = jnp.sum(centered * centered, axis=1, keepdims=True) * inv_l
    inv_std = lax.rsqrt(var + 1e-5)                                 # EUP
    # Bake D^-1/4 into yn so <yn, yn> already carries the 1/sqrt(D) Gram scale.
    yn_ref[...] = (centered * (inv_std * gram_scale)).astype(yn_ref.dtype)


# ---------------------------------------------------------------------------
# Stage 2: Gram scores + softmax over the BATCH axis, tiled over (rows, cols).
# Legal because every tile spans the full batch axis (softmax is per (l, s)).
# ---------------------------------------------------------------------------
def _scores_softmax_kernel(rows_ref, cols_ref, out_ref):
    """rows_ref: (B, TR, D) bf16; cols_ref: (B, TC, D) bf16; out_ref: (B, TR, TC)."""
    s = jnp.einsum("brd,bcd->brc", rows_ref[...], cols_ref[...],
                   preferred_element_type=jnp.float32)              # scale already baked
    m = jnp.max(s, axis=0, keepdims=True)
    e = jnp.exp(s - m)
    denom = jnp.sum(e, axis=0, keepdims=True)
    # approx reciprocal: per-(l,s) batch probabilities sum to 1 within ~1e-3 (inference).
    out_ref[...] = (e * pl.reciprocal(denom, approx=True)).astype(out_ref.dtype)


# ---------------------------------------------------------------------------
# Wrapper
# ---------------------------------------------------------------------------
def time_generate_graph(x, conv_weight, *, out_dtype=jnp.float32):
    """x: (B, L, D) float32. conv_weight: (D_out, D_in, K) torch-style Conv1d weight."""
    B, L, D = x.shape
    K = conv_weight.shape[-1]
    x = x.astype(jnp.float32)

    # Fold the K taps into one (K*D_in, D_out) matrix: w_fused[k*D + e, d] = w[d, e, k].
    w_fused = jnp.transpose(conv_weight, (2, 1, 0)).reshape(K * D, D).astype(jnp.bfloat16)

    vmem_cap = _vmem_capacity_bytes()
    vmem_limit = min(int(vmem_cap * 0.75), 96 * 1024 * 1024)   # headroom for compiler scratch
    tile_budget = int(vmem_limit * 0.75)                       # headroom for in-kernel temps

    fuse_taps = D < _mxu_contraction_depth()
    gram_scale = float(D) ** -0.25                             # per-operand half of 1/sqrt(D)

    # ---- Stage 1: circular conv + normalization -> yn (B, L, D) bf16 ----
    bt = _pick_stage1_batch_tile(B, L, D, K, tile_budget)
    yn = pl.pallas_call(
        functools.partial(_conv_norm_kernel, kernel_size=K,
                          fuse_taps=fuse_taps, gram_scale=gram_scale),
        out_shape=jax.ShapeDtypeStruct((B, L, D), jnp.bfloat16),
        grid_spec=pltpu.PrefetchScalarGridSpec(
            num_scalar_prefetch=0,
            grid=(B // bt,),
            in_specs=[
                pl.BlockSpec((bt, L, D), lambda b: (b, 0, 0)),
                pl.BlockSpec((K * D, D), lambda b: (0, 0)),    # batch-shared weight
            ],
            out_specs=pl.BlockSpec((bt, L, D), lambda b: (b, 0, 0)),
        ),
        compiler_params=pltpu.CompilerParams(
            dimension_semantics=("parallel",),
            vmem_limit_bytes=vmem_limit,
        ),
    )(x, w_fused)

    # ---- Stage 2: Gram + batch-axis softmax, asymmetric (tr, tc) tiling ----
    tr, tc, Lp = _pick_stage2_tiles(B, L, D, tile_budget)
    yn_p = yn if Lp == L else jnp.pad(yn, ((0, 0), (0, Lp - L), (0, 0)))

    out = pl.pallas_call(
        _scores_softmax_kernel,
        out_shape=jax.ShapeDtypeStruct((B, Lp, Lp), out_dtype),
        grid_spec=pltpu.PrefetchScalarGridSpec(
            num_scalar_prefetch=0,
            grid=(Lp // tr, Lp // tc),
            in_specs=[
                pl.BlockSpec((B, tr, D), lambda i, j: (0, i, 0)),
                pl.BlockSpec((B, tc, D), lambda i, j: (0, j, 0)),
            ],
            out_specs=pl.BlockSpec((B, tr, tc), lambda i, j: (0, i, j)),
        ),
        compiler_params=pltpu.CompilerParams(
            dimension_semantics=("parallel", "parallel"),
            vmem_limit_bytes=vmem_limit,
        ),
    )(yn_p, yn_p)

    if Lp != L:
        out = out[:, :L, :L]
    return out


# ---------------------------------------------------------------------------
# Plain-JAX reference (f32) mirroring the PyTorch forward (eval mode).
# ---------------------------------------------------------------------------
def _reference(x, conv_weight):
    B, L, D = x.shape
    K = conv_weight.shape[-1]
    half = K // 2
    y = jnp.zeros((B, L, D), dtype=jnp.float32)
    for k in range(K):
        xs = jnp.roll(x, shift=half - k, axis=1)          # xs[l] = x[(l + k - half) % L]
        y = y + jnp.einsum("ble,de->bld", xs, conv_weight[:, :, k])
    mean = jnp.mean(y, axis=1, keepdims=True)
    var = jnp.mean((y - mean) ** 2, axis=1, keepdims=True)  # biased, eps inside sqrt
    yn = (y - mean) / jnp.sqrt(var + 1e-5)
    scores = jnp.einsum("ble,bse->bls", yn, yn) / math.sqrt(D)
    return jax.nn.softmax(scores, axis=0)                 # softmax over batch (dim=-3)


if __name__ == "__main__":
    B, L, D, KSIZE = 2, 8, 32, 5

    key = jax.random.PRNGKey(0)
    kx, kw = jax.random.split(key)
    x = jax.random.normal(kx, (B, L, D), dtype=jnp.float32)
    # deterministic Conv1d weight, shape (out_channels, in_channels, kernel_size)
    conv_weight = jax.random.normal(kw, (D, D, KSIZE), dtype=jnp.float32) * (
        1.0 / math.sqrt(D * KSIZE))

    out = jax.block_until_ready(time_generate_graph(x, conv_weight))
    ref = _reference(x, conv_weight)

    assert out.shape == (B, L, L)
    # Structural check: softmax over the batch axis sums to 1 (approx reciprocal -> loose).
    assert jnp.allclose(jnp.sum(out, axis=0), 1.0, atol=5e-3)
    # bf16 MXU path + bf16 yn + approx reciprocal vs an all-f32 reference -> loose tol.
    assert jnp.allclose(out, ref, atol=5e-2, rtol=5e-2), "mismatch vs reference"

    print("KERNEL_OK")
</pallas_src>

<mosaic_0001>
module attributes {stable_mosaic.version = 11 : i64} {
  func.func @_conv_norm_kernel(%arg0: i32, %arg1: memref<1x8x32xf32, #tpu.memory_space<vmem>>, %arg2: memref<160x32xbf16, #tpu.memory_space<vmem>>, %arg3: memref<1x8x32xbf16, #tpu.memory_space<vmem>>) attributes {dimension_semantics = [#tpu.dimension_semantics<parallel>], iteration_bounds = array<i64: 2>, scalar_prefetch = 0 : i64, scratch_operands = 0 : i64, tpu.core_type = #tpu.core_type<tc>, window_params = [{transform_indices = @transform_0, window_bounds = array<i64: 1, 8, 32>}, {pipeline_mode = #tpu.pipeline_mode<synchronous>, transform_indices = @transform_1, window_bounds = array<i64: 160, 32>}, {transform_indices = @transform_2, window_bounds = array<i64: 1, 8, 32>}]} {
    %c0 = arith.constant 0 : index
    %c0_0 = arith.constant 0 : index
    %c0_1 = arith.constant 0 : index
    %0 = vector.load %arg1[%c0, %c0_0, %c0_1] : memref<1x8x32xf32, #tpu.memory_space<vmem>>, vector<1x8x32xf32>
    %1 = vector.extract_strided_slice %0 {offsets = [0, 6, 0], sizes = [1, 2, 32], strides = [1, 1, 1]} : vector<1x8x32xf32> to vector<1x2x32xf32>
    %2 = vector.extract_strided_slice %0 {offsets = [0, 0, 0], sizes = [1, 2, 32], strides = [1, 1, 1]} : vector<1x8x32xf32> to vector<1x2x32xf32>
    %3 = tpu.concatenate %1, %0, %2 in 1 : vector<1x2x32xf32>, vector<1x8x32xf32>, vector<1x2x32xf32> -> vector<1x12x32xf32>
    %4 = vector.extract_strided_slice %3 {offsets = [0, 0, 0], sizes = [1, 8, 32], strides = [1, 1, 1]} : vector<1x12x32xf32> to vector<1x8x32xf32>
    %5 = vector.extract_strided_slice %3 {offsets = [0, 1, 0], sizes = [1, 8, 32], strides = [1, 1, 1]} : vector<1x12x32xf32> to vector<1x8x32xf32>
    %6 = vector.extract_strided_slice %3 {offsets = [0, 2, 0], sizes = [1, 8, 32], strides = [1, 1, 1]} : vector<1x12x32xf32> to vector<1x8x32xf32>
    %7 = vector.extract_strided_slice %3 {offsets = [0, 3, 0], sizes = [1, 8, 32], strides = [1, 1, 1]} : vector<1x12x32xf32> to vector<1x8x32xf32>
    %8 = vector.extract_strided_slice %3 {offsets = [0, 4, 0], sizes = [1, 8, 32], strides = [1, 1, 1]} : vector<1x12x32xf32> to vector<1x8x32xf32>
    %9 = tpu.concatenate %4, %5, %6, %7, %8 in 2 : vector<1x8x32xf32>, vector<1x8x32xf32>, vector<1x8x32xf32>, vector<1x8x32xf32>, vector<1x8x32xf32> -> vector<1x8x160xf32>
    %10 = vector.shape_cast %9 : vector<1x8x160xf32> to vector<8x160xf32>
    %11 = arith.truncf %10 : vector<8x160xf32> to vector<8x160xbf16>
    %c0_2 = arith.constant 0 : index
    %c0_3 = arith.constant 0 : index
    %12 = vector.load %arg2[%c0_2, %c0_3] : memref<160x32xbf16, #tpu.memory_space<vmem>>, vector<160x32xbf16>
    %cst = arith.constant dense<0.000000e+00> : vector<8x32xf32>
    %13 = tpu.matmul %11, %12, %cst {dimension_numbers = #tpu.dot_dimension_numbers<[1], [0], [0], [1], [0, 0, 1, 1], [], []>} : vector<8x160xbf16>, vector<160x32xbf16>, vector<8x32xf32> -> vector<8x32xf32>
    %14 = vector.shape_cast %13 : vector<8x32xf32> to vector<1x8x32xf32>
    %cst_4 = arith.constant dense<0.000000e+00> : vector<1x32xf32>
    %15 = vector.multi_reduction <add>, %14, %cst_4 [1] : vector<1x8x32xf32> to vector<1x32xf32>
    %16 = vector.shape_cast %15 : vector<1x32xf32> to vector<1x1x32xf32>
    %cst_5 = arith.constant 1.250000e-01 : f32
    %17 = vector.broadcast %cst_5 : f32 to vector<1x1x32xf32>
    %18 = arith.mulf %16, %17 : vector<1x1x32xf32>
    %19 = vector.broadcast %18 : vector<1x1x32xf32> to vector<1x8x32xf32>
    %20 = arith.subf %14, %19 : vector<1x8x32xf32>
    %21 = arith.mulf %20, %20 : vector<1x8x32xf32>
    %cst_6 = arith.constant dense<0.000000e+00> : vector<1x32xf32>
    %22 = vector.multi_reduction <add>, %21, %cst_6 [1] : vector<1x8x32xf32> to vector<1x32xf32>
    %23 = vector.shape_cast %22 : vector<1x32xf32> to vector<1x1x32xf32>
    %cst_7 = arith.constant 1.250000e-01 : f32
    %24 = vector.broadcast %cst_7 : f32 to vector<1x1x32xf32>
    %25 = arith.mulf %23, %24 : vector<1x1x32xf32>
    %cst_8 = arith.constant 9.99999974E-6 : f32
    %26 = vector.broadcast %cst_8 : f32 to vector<1x1x32xf32>
    %27 = arith.addf %25, %26 : vector<1x1x32xf32>
    %28 = math.rsqrt %27 : vector<1x1x32xf32>
    %cst_9 = arith.constant 0.420448214 : f32
    %29 = vector.broadcast %cst_9 : f32 to vector<1x1x32xf32>
    %30 = arith.mulf %28, %29 : vector<1x1x32xf32>
    %31 = vector.broadcast %30 : vector<1x1x32xf32> to vector<1x8x32xf32>
    %32 = arith.mulf %20, %31 : vector<1x8x32xf32>
    %33 = arith.truncf %32 : vector<1x8x32xf32> to vector<1x8x32xbf16>
    %c0_10 = arith.constant 0 : index
    %c0_11 = arith.constant 0 : index
    %c0_12 = arith.constant 0 : index
    %34 = vector.load %arg3[%c0_10, %c0_11, %c0_12] : memref<1x8x32xbf16, #tpu.memory_space<vmem>>, vector<1x8x32xbf16>
    tpu.vector_store %arg3[%c0_10, %c0_11, %c0_12], %33 {strides = array<i32>} : memref<1x8x32xbf16, #tpu.memory_space<vmem>>, vector<1x8x32xbf16>,
    return
  }
  func.func @transform_0(%arg0: i32) -> (i32, i32, i32) {
    %c0_i32 = arith.constant 0 : i32
    %c0_i32_0 = arith.constant 0 : i32
    %c0_i32_1 = arith.constant 0 : i32
    return %arg0, %c0_i32, %c0_i32_0 : i32, i32, i32
  }
  func.func @transform_1(%arg0: i32) -> (i32, i32) {
    %c0_i32 = arith.constant 0 : i32
    %c0_i32_0 = arith.constant 0 : i32
    %c0_i32_1 = arith.constant 0 : i32
    return %c0_i32, %c0_i32_0 : i32, i32
  }
  func.func @transform_2(%arg0: i32) -> (i32, i32, i32) {
    %c0_i32 = arith.constant 0 : i32
    %c0_i32_0 = arith.constant 0 : i32
    %c0_i32_1 = arith.constant 0 : i32
    return %arg0, %c0_i32, %c0_i32_0 : i32, i32, i32
  }
}

</mosaic_0001>

<bundles_post_ra>
// kernel: tpu_custom_call.1
= control target key start
LH: loop header
LB: loop body
LE: loop exit
PB: predicated region body
PF: predicated region fallthrough
CT: control target
= control target key end

     0   :  { %7 = vsyncpa [#allocation3], 0  ;;  %s692_s0 = inlined_call_operand.vmem [shape: f32[2,8,32], index: 0, kind: input, shape index: {}]   ;;  %s693_s1 = inlined_call_operand.vmem [shape: bf16[160,32], index: 1, kind: input, shape index: {}]   ;;  %s694_s2 = inlined_call_operand.hbm [shape: bf16[2,8,32], index: 2, kind: output, shape index: {}]  }
   0x1   :  { %9 = vsyncpa [#allocation3 + $0x1], 0  ;;  %s558_s9 = smov 0   ;;  %s560_s10 = smov 0  }
   0x2   :  { %s562_s11 = smov 0   ;;  %s564_s12 = smov 0  }
   0x3 LB: > { %s579_s13 = sadd.s32 4294967295, %s536_s12   ;;  %s398_s14 = sadd.s32 4294967294, %s536_s12   ;;  %s536_s12 = sphi %s564_s12, %s700_s12   ;;  %s532_s11 = sphi %s562_s11, %s699_s11   ;;  %s528_s10 = sphi %s560_s10, %s698_s10   ;;  %s524_s9 = sphi %s558_s9, %s697_s9  }
   0x4   : > { %s583_s15 = sadd.s32 1, %s536_s12   ;;  %s69_s16 = sadd.s32 1, %s532_s11 }
   0x5   : > { %s66_s17 = ssub.s32 %s536_s12, %s583_s15  ;;  %p79_p0 = scmp.ne.s32.totalorder %s532_s11, %s528_s10 }
   0x6   : > { %p67_p1 = scmp.eq.s32.totalorder %s66_s17, 0  ;;  %p80_p2 = scmp.eq.s32.totalorder %s579_s13, 1 }
   0x7   : > { %p85_p3 = scmp.ne.s32.totalorder %s528_s10, %s524_s9  ;;  %p86_p4 = scmp.eq.s32.totalorder %s398_s14, 1 }
   0x8   : > { %s594_s18 = scalar_select %p67_p1, %s532_s11, %s69_s16  }
   0x9   : > { %p596_p5 = por %p80_p2, %p79_p0  ;;  %p600_p6 = por %p86_p4, %p85_p3 }
   0xa   : > { %p401_p7 = scmp.ge.s32.totalorder %s536_s12, 1  ;;  %p114_p8 = scmp.lt.s32.totalorder %s536_s12, 3 }
   0xc   : > { %p115_p9 = pnand %p401_p7, %p114_p8 }
   0xd   : > { %p135_p10 = scmp.lt.s32.totalorder (!%p115_p9), %s579_s13, 1  ;;  %v462_v0 = vld [vmem:[%s693_s1] sm:$0xff] (!%p115_p9)   ;;  %v538_v1 = vmov (!%p115_p9), 0   ;;  %v463_v2 = vld [vmem:[%s693_s1 + $0x8] sm:$0xff] (!%p115_p9)   ;;  %v464_v4 = vld [vmem:[%s693_s1 + $0x10] sm:$0xff] (!%p115_p9)   ;;  %s539_s6 = smov (!%p115_p9), 32  }
   0xe   : > { %118 = sbr.rel (%p115_p9) target bundleno = 432 (0x1b0), region = 28  ;;  %260 = vmatprep.subr.bf16.mxu0 (!%p115_p9), %v538_v1  ;;  %v465_v8 = vld [vmem:[%s693_s1 + $0x18] sm:$0xff] (!%p115_p9)   ;;  %s540_s7 = smov (!%p115_p9), 96   ;;  %v466_v12 = vld [vmem:[%s693_s1 + $0x20] sm:$0xff] (!%p115_p9)   ;;  %vm169_vm0 = vcmask (!%p115_p9), 261120   ;;  %v467_v13 = vld [vmem:[%s693_s1 + $0x28] sm:$0xff] (!%p115_p9)  }
   0xf   : > { %261 = vmatpush1.bf16.msra.mxu0 (!%p115_p9), %v462_v0  ;;  %s541_s16 = smov (!%p115_p9), 64   ;;  %v468_v14 = vld [vmem:[%s693_s1 + $0x30] sm:$0xff] (!%p115_p9)   ;;  %v469_v15 = vld [vmem:[%s693_s1 + $0x38] sm:$0xff] (!%p115_p9)   ;;  %v470_v16 = vld [vmem:[%s693_s1 + $0x40] sm:$0xff] (!%p115_p9)   ;;  %vm171_vm1 = vcmask (!%p115_p9), 523264   ;;  %vm173_vm2 = vcmask (!%p115_p9), 785408  }
  0x10   : > { %262 = vmatprep.subr.bf16.mxu0 (!%p115_p9), %v538_v1  ;;  %v471_v17 = vld [vmem:[%s693_s1 + $0x48] sm:$0xff] (!%p115_p9)   ;;  %s132_s30 = sand.u32 (!%p115_p9), 1, %s528_s10   ;;  %s416_s4 = sshll.u32 (!%p115_p9), %s579_s13, 6  ;;  %vm323_vm3 = vcmask (!%p115_p9), 257024  }
  0x11   : > { %s402_s3 = sshll.u32 (!%p115_p9), %s132_s30, 2  ;;  %s650_s14 = scalar_lea.hbm (!%p115_p9), %s694_s2, %s416_s4 }
  0x12   : > { %s134_s5 = scalar_lea.vmem (!%p115_p9), [#allocation2], %s402_s3 }
  0x13   : > { %263 = vmatpush1.bf16.msra.mxu0 (!%p115_p9), %v463_v2 }
  0x14   : > { %264 = vmatprep.subr.bf16.mxu0 (!%p115_p9), %v538_v1 }
  0x15   : > { %s136_s23 = scalar_select %p135_p10, %s579_s13, 1 }
  0x16   : > { %s542_s13 = smov [#allocation2]  }
  0x17   : > { %s403_s26 = sshll.u32 %s136_s23, 3  ;;  %265 = vmatpush1.bf16.msra.mxu0 %v464_v4  ;;  %s478_s21 = sshll.u32 %s542_s13, 4  ;;  %s479_s21 = int_to_ptr.vmem [resolvable:$false] %s478_s21 }
  0x18   : > { %s138_s29 = scalar_lea.vmem %s692_s0, %s403_s26  ;;  %266 = vmatprep.subr.bf16.mxu0 %v538_v1  ;;  %s480_s22 = scalar_lea.vmem %s479_s21, 128 }
  0x19   : > { %v140_v3 = vld [vmem:[%s138_s29] sm:$0xff] }
  0x1a   : > { %v142_v5 = vrot.slane %v140_v3, 6 }
  0x1b   : > { %267 = vmatpush1.bf16.msra.mxu0 %v465_v8 }
  0x1c   : > { %v148_v6 = vrot.slane %v142_v5, 1  ;;  %v160_v7 = vrot.slane %v142_v5, 3  ;;  %v154_v9 = vrot.slane %v142_v5, 2  ;;  %v166_v10 = vrot.slane %v142_v5, 4  ;;  %268 = vmatprep.subr.bf16.mxu0 %v538_v1 }
  0x1e   : > { %150 = vrot.lane.b32.xlu0 %v148_v6, %s539_s6  ;;  %162 = vrot.lane.b32.xlu1 %v160_v7, %s540_s7  ;;  %v176_v11 = vpack.c.bf16 %v166_v10, %v166_v10  ;;  %s339_s6 = sshll.u32 %s134_s5, 4  ;;  %s652_s6 = int_to_ptr.vmem [resolvable:$true] %s339_s6 }
  0x1f   : > { %269 = vmatpush1.bf16.msra.mxu0 %v466_v12  ;;  %s474_s17 = scalar_lea.vmem %s652_s6, 64  ;;  %p481_p0 = scmp.lt.s32.totalorder %s652_s6, %s479_s21 }
  0x20   : > { %414 = vmatprep.mubr.msk.bf16.mxu0 %vm169_vm0, %v176_v11  ;;  %270 = vmatprep.subr.bf16.mxu0 %v538_v1  ;;  %p475_p11 = scmp.ne.s32.totalorder %s652_s6, %s474_s17  ;;  %p482_p1 = scmp.lt.s32.totalorder %s480_s22, %s474_s17 }
  0x22   : > { %156 = vrot.lane.b32.xlu0 %v154_v9, %s541_s16  ;;  %s326_s16 = scalar_lea.sflag [#allocation3], %s132_s30  ;;  %p476_p12 = pnand %p475_p11, %p596_p5 }
  0x23   : > { %271 = vmatpush1.bf16.msra.mxu0 %v467_v13  ;;  %p483_p2 = por %p482_p1, %p481_p0 }
  0x24   : > { %272 = vmatprep.subr.bf16.mxu0 %v538_v1  ;;  %p477_p13 = pneg %p476_p12 }
  0x26   : > { %p484_p3 = pnand %p483_p2, %p477_p13 }
  0x27   : > { %273 = vmatpush1.bf16.msra.mxu0 %v468_v14 }
  0x28   : > { %274 = vmatprep.subr.bf16.mxu0 %v538_v1 }
  0x2b   : > { %275 = vmatpush1.bf16.msra.mxu0 %v469_v15 }
  0x2c   : > { %276 = vmatprep.subr.bf16.mxu0 %v538_v1 }
  0x2f   : > { %277 = vmatpush1.bf16.msra.mxu0 %v470_v16 }
  0x30   : > { %278 = vmatprep.subr.bf16.mxu0 %v538_v1 }
  0x33   : > { %279 = vmatpush1.bf16.msra.mxu0 %v471_v17 }
  0x90   : > { %v151_v18 = vpop.permute.xlu0 %150  ;;  %v163_v19 = vpop.permute.xlu1 %162 }
  0x91   : > { %v170_v20 = vsel %vm169_vm0, %v142_v5, %v151_v18 }
  0x94   : > { %v157_v21 = vpop.permute.xlu0 %156 }
  0x95   : > { %v172_v22 = vsel %vm171_vm1, %v170_v20, %v157_v21 }
  0x96   : > { %v174_v23 = vsel %vm173_vm2, %v172_v22, %v163_v19 }
  0x97   : > { %v175_v24 = vpack.c.bf16 %v174_v23, %v174_v23 }
  0x99   : > { %293 = vmatmul.mubr.bf16.vlgmr.msra.gmra.mrb[0].mxu0 %v175_v24 }
 0x16c   : > { %v294_v25 = vpop.f32.mrb[0].mxu0 }
 0x16d   : > { %v300_v26 = vsel %vm169_vm0, %v294_v25, 0.0  ;;  %v296_v27 = vpop.f32.mrb[1].mxu0 }
 0x16e   : > { %v301_v28 = vrot.slane %v300_v26, 4  ;;  %v297_v29 = vpop.f32.mrb[2].mxu0 }
 0x16f   : > { %v298_v30 = vpop.f32.mrb[3].mxu0 }
 0x170   : > { %v302_v31 = vadd.f32 %v301_v28, %v300_v26 }
 0x172   : > { %v303_v32 = vrot.slane %v302_v31, 2 }
 0x174   : > { %v304_v33 = vadd.f32 %v303_v32, %v302_v31 }
 0x176   : > { %v305_v34 = vrot.slane %v304_v33, 1 }
 0x178   : > { %v306_v35 = vadd.f32 %v305_v34, %v304_v33 }
 0x17a   : > { %v307_v36 = vmul.f32 0.125, %v306_v35 }
 0x17c   : > { %v308_v37 = vsub.f32 %v294_v25, %v307_v36 }
 0x17e   : > { %v309_v38 = vmul.f32 %v308_v37, %v308_v37 }
 0x180   : > { %v310_v39 = vsel %vm169_vm0, %v309_v38, 0.0 }
 0x181   : > { %v311_v40 = vrot.slane %v310_v39, 4 }
 0x183   : > { %v312_v41 = vadd.f32 %v311_v40, %v310_v39 }
 0x185   : > { %v313_v42 = vrot.slane %v312_v41, 2 }
 0x187   : > { %v314_v43 = vadd.f32 %v313_v42, %v312_v41 }
 0x189   : > { %v315_v44 = vrot.slane %v314_v43, 1 }
 0x18b   : > { %v316_v45 = vadd.f32 %v315_v44, %v314_v43 }
 0x18d   : > { %v317_v46 = vmul.f32 0.125, %v316_v45 }
 0x18f   : > { %v318_v47 = vadd.f32 1e-05, %v317_v46 }
 0x191   : > { %472 = vrsqrt.f32 %v318_v47 }
 0x19b   : > { %v473_v48 = vpop.eup %472 }
 0x19c   : > { %v320_v49 = vmul.f32 0.4204482, %v473_v48 }
 0x19e   : > { %v321_v50 = vmul.f32 %v320_v49, %v308_v37 }
 0x1a0   : > { %v322_v51 = vpack.c.bf16 %v321_v50, %v321_v50 }
 0x1a2   : > { %324 = vst.msk [vmem:[%s134_s5] sm:$0xf] %vm323_vm3, %v322_v51 }
 0x1a3   : > { %487 = shalt.err (!%p484_p3)
}
 0x1a4   : > { %s488_s23 = scalar_lea.hbm %s650_s14, 64  ;;  %s492_s26 = scalar_lea.hbm %s694_s2, 128 }
 0x1a5   : > { %p489_p4 = scmp.ne.s32.totalorder %s650_s14, %s488_s23  ;;  %p493_p9 = scmp.lt.u32.totalorder %s650_s14, %s694_s2 }
 0x1a6   : > { %p494_p10 = scmp.lt.u32.totalorder %s492_s26, %s488_s23  ;;  %p496_p12 = scmp.lt.u32.totalorder %s488_s23, %s650_s14 }
 0x1a7   : > { %p490_p7 = pnand %p489_p4, %p596_p5 }
 0x1a8   : > { %p495_p11 = por %p494_p10, %p493_p9 }
 0x1a9   : > { %p491_p8 = pneg %p490_p7 }
 0x1aa   : > { %p497_p13 = por %p496_p12, %p495_p11 }
 0x1ac   : > { %p498_p0 = pnand %p497_p13, %p491_p8 }
 0x1ae   : > { %501 = shalt.err (!%p498_p0)
}
 0x1af   : > { %419 = dma.vmem_to_hbm [thread:$0]  (%p596_p5), %s652_s6, 64, %s650_s14, %s326_s16  }
 0x1b0 PF: > { %p425_p1 = scmp.ge.s32.totalorder %s536_s12, 2  ;;  %s351_s29 = sand.u32 1, %s524_s9  }
 0x1b1   : > { %s352_s30 = scalar_lea.sflag [#allocation3], %s351_s29 }
 0x1b2   : > { %p422_p2 = pnand %p425_p1, %p600_p6 }
 0x1b4   : > { %519 = dma.done.wait (!%p422_p2), %s352_s30, 64  }
 0x1b5   : > { %521 = vsyncadd (!%p422_p2), %s352_s30, 4294967232  ;;  %p12_p3 = scmp.ge.s32.totalorder %s583_s15, 4   ;;  %s697_s9 = smov %s528_s10 }
 0x1b6   : > { %s698_s10 = smov %s532_s11  ;;  %s699_s11 = smov %s594_s18 }
 0x1b7   : > { %s700_s12 = smov %s583_s15  ;;  %14 = sbr.rel (!%p12_p3) target bundleno = 3 (0x3), region = 63 }
 0x1be   :  { %357 = vsyncpa [#allocation3], 1 }
 0x1bf   :  { %359 = vsyncpa [#allocation3 + $0x1], 1 }

</bundles_post_ra>
